<compile_context>
chip_gen: v6e
topology: v6e:2x2x1
jax: 0.10.0
libtpu: 0.0.40
codegen_flags: <defaults>
</compile_context>

<pallas_src>
import functools

import jax
import jax.numpy as jnp
import numpy as np
from jax.experimental import pallas as pl
from jax.experimental.pallas import tpu as pltpu

LARGE_NEG = -100000.0     # matches the PyTorch module
PAD_NEG = -1.0e30         # padded lanes: below any real priority, still finite (no inf-inf NaNs)
LANE = 128                # TPU vreg lane width


def get_init_priorities(n_context: int) -> jnp.ndarray:
    """probs_to_logits(probs, is_binary=True) == logit(p) = log(p) - log(1-p)."""
    probs = jnp.array([0.5 / (i + 1) for i in range(n_context)], dtype=jnp.float32)
    return jnp.log(probs) - jnp.log1p(-probs)


def _act_kernel(logits_ref, layer_ref, masks_ref, init_ref, *rest,
                n_passages: int, greedy: bool):
    """Inputs (full-array VMEM blocks, P padded to a multiple of 128 on lanes):
         logits_ref : [B, Ppad, L] f32   all_has_answer_logits
         layer_ref  : [B, Ppad]    i32   layer_indices (-1 selects the init prior)
         masks_ref  : [B, Ppad]    f32
         init_ref   : [1, Ppad]    f32   init_priorities[:n_passages] (broadcast in-kernel)
         gumbel_ref : [B, Ppad]    f32   (sampling path only)
       Outputs:
         action_ref : [B, 1] i32
         logp_ref   : [B, 1] f32
    """
    if greedy:
        action_ref, logp_ref = rest
    else:
        gumbel_ref, action_ref, logp_ref = rest

    bsz, p_pad, L = logits_ref.shape

    logits = logits_ref[...]                                   # [B, Ppad, L]
    layer_idx = layer_ref[...]                                 # [B, Ppad] i32
    masks = masks_ref[...]                                     # [B, Ppad]
    init_prior = init_ref[...]                                 # [1, Ppad]

    # has_answer_logits = cat([init, logits], -1).gather(2, layer_idx + 1):
    #   layer_idx == -1 -> init prior, layer_idx == k -> logits[..., k]
    # One-hot over the (small, static) layer axis + lane reduce on the natural layout.
    # TODO(synk): layer_idx outside [-1, L-1] silently yields 0 (torch.gather would error).
    l_iota = jax.lax.broadcasted_iota(jnp.int32, (bsz, p_pad, L), 2)
    sel = l_iota == layer_idx[:, :, None]
    from_layers = jnp.sum(jnp.where(sel, logits, 0.0), axis=-1)         # [B, Ppad]
    gathered = jnp.where(layer_idx < 0, init_prior, from_layers)        # [B, Ppad]

    # TODO(synk): BaseScheduler.forward() is abstract (raises NotImplementedError);
    # identity forward is used here (priorities = gathered has_answer_logits).
    priorities = gathered + (1.0 - masks) * LARGE_NEG                   # [B, Ppad]

    # Padded lanes can never win -- not even against fully-masked rows.
    p_iota = jax.lax.broadcasted_iota(jnp.int32, (bsz, p_pad), 1)
    priorities = jnp.where(p_iota < n_passages, priorities, PAD_NEG)

    maxp = jnp.max(priorities, axis=-1, keepdims=True)                  # shared reduction

    def first_argmax(scores, max_scores):
        cand = jnp.where(scores == max_scores, p_iota, p_pad)
        return jnp.min(cand, axis=-1, keepdims=True)                    # [B, 1] i32

    if greedy:
        action = first_argmax(priorities, maxp)
        log_prob = jnp.full((bsz, 1), -1.0, jnp.float32)
    else:
        # Categorical(logits=priorities).sample() via Gumbel-max.
        perturbed = priorities + gumbel_ref[...]
        maxg = jnp.max(perturbed, axis=-1, keepdims=True)
        action = first_argmax(perturbed, maxg)                          # [B, 1]

        # log_prob(action) = priorities[b, a] - logsumexp(priorities[b, :])
        logz = maxp + jnp.log(
            jnp.sum(jnp.exp(priorities - maxp), axis=-1, keepdims=True))
        chosen = jnp.sum(jnp.where(p_iota == action, priorities, 0.0),
                         axis=-1, keepdims=True)
        log_prob = chosen - logz

    # One full-block store per output (no masked sub-lane read-modify-write stores).
    action_ref[...] = action.astype(jnp.int32)
    logp_ref[...] = log_prob


def scheduler_act(init_priorities, all_has_answer_logits, layer_indices, masks,
                  *, greedy=False, key=None):
    bsz, n_passages, num_layers = all_has_answer_logits.shape
    p_pad = ((n_passages + LANE - 1) // LANE) * LANE     # lane-dense reduction axis
    pad = p_pad - n_passages

    logits = all_has_answer_logits.astype(jnp.float32)
    layer_p = layer_indices.astype(jnp.int32)
    masks_p = masks.astype(jnp.float32)
    if pad:
        logits = jnp.pad(logits, ((0, 0), (0, pad), (0, 0)))
        layer_p = jnp.pad(layer_p, ((0, 0), (0, pad)))
        masks_p = jnp.pad(masks_p, ((0, 0), (0, pad)))   # masks=0 on pads
    init_p = jnp.pad(init_priorities[:n_passages].astype(jnp.float32),
                     (0, pad)).reshape(1, p_pad)

    inputs = [logits, layer_p, masks_p, init_p]
    if not greedy:
        if key is None:
            key = jax.random.PRNGKey(0)
        # Drawn directly at the padded width; padded lanes lose anyway (PAD_NEG).
        inputs.append(jax.random.gumbel(key, (bsz, p_pad), dtype=jnp.float32))

    kernel = functools.partial(_act_kernel, n_passages=n_passages, greedy=greedy)

    in_bytes = sum(int(np.prod(x.shape)) * x.dtype.itemsize for x in inputs)
    cost = pl.CostEstimate(
        flops=int(bsz * p_pad * (num_layers + 10)),
        transcendentals=0 if greedy else int(bsz * p_pad),
        bytes_accessed=int(in_bytes + bsz * 8),
    )

    vmem_spec = functools.partial(pl.BlockSpec, memory_space=pltpu.MemorySpace.VMEM)
    action, log_prob = pl.pallas_call(
        kernel,
        out_shape=(jax.ShapeDtypeStruct((bsz, 1), jnp.int32),
                   jax.ShapeDtypeStruct((bsz, 1), jnp.float32)),
        in_specs=[vmem_spec() for _ in inputs],
        out_specs=(vmem_spec(), vmem_spec()),
        cost_estimate=cost,
    )(*inputs)
    # TODO(synk): if act() runs once per decoding step, batch T steps into a leading
    # grid axis of a single pallas_call (or leave it fused in XLA); at this size the
    # call is launch-overhead bound.
    return action[:, 0], log_prob[:, 0]


def _ref_priorities(init_priorities, all_has_answer_logits, layer_indices, masks):
    """Pure-JAX reference of the priority math (mirrors the PyTorch code)."""
    bsz, n_passages, _ = all_has_answer_logits.shape
    init = jnp.broadcast_to(init_priorities[:n_passages], (bsz, n_passages))[..., None]
    cat = jnp.concatenate([init, all_has_answer_logits.astype(jnp.float32)], axis=-1)
    gathered = jnp.take_along_axis(cat, (layer_indices + 1)[..., None], axis=-1)[..., 0]
    return gathered + (1.0 - masks) * LARGE_NEG


if __name__ == "__main__":
    bsz, n_passages, num_layers = 2, 8, 6
    scheduler_n_context = 16   # config.scheduler_n_context (>= n_passages)

    key = jax.random.PRNGKey(0)
    k1, k2, k3, k4 = jax.random.split(key, 4)
    all_has_answer_logits = jax.random.normal(
        k1, (bsz, n_passages, num_layers), dtype=jnp.float32)
    # layer_indices in [-1, num_layers-1]; -1 selects the learned init prior.
    layer_indices = jax.random.randint(k2, (bsz, n_passages), -1, num_layers,
                                       dtype=jnp.int32)
    masks = (jax.random.uniform(k3, (bsz, n_passages)) > 0.3).astype(jnp.float32)

    init_priorities = get_init_priorities(scheduler_n_context)  # nn.Parameter init

    # Greedy path.
    a_g, lp_g = scheduler_act(init_priorities, all_has_answer_logits,
                              layer_indices, masks, greedy=True)
    # Sampling path (Categorical via Gumbel-max), per-call key.
    a_s, lp_s = scheduler_act(init_priorities, all_has_answer_logits,
                              layer_indices, masks, greedy=False, key=k4)
    # Fully-masked-row edge case (greedy): LARGE_NEG is finite, so the gathered logits
    # still decide the argmax; must match the reference.
    masks_edge = masks.at[0].set(0.0)
    a_e, lp_e = scheduler_act(init_priorities, all_has_answer_logits,
                              layer_indices, masks_edge, greedy=True)

    jax.block_until_ready((a_g, lp_g, a_s, lp_s, a_e, lp_e))

    # Correctness checks against a pure-JAX reference of the PyTorch math.
    pri = _ref_priorities(init_priorities, all_has_answer_logits, layer_indices, masks)
    np.testing.assert_array_equal(
        np.asarray(a_g), np.asarray(jnp.argmax(pri, axis=-1).astype(jnp.int32)))
    np.testing.assert_allclose(np.asarray(lp_g), -np.ones(bsz, np.float32))

    pri_e = _ref_priorities(init_priorities, all_has_answer_logits, layer_indices, masks_edge)
    np.testing.assert_array_equal(
        np.asarray(a_e), np.asarray(jnp.argmax(pri_e, axis=-1).astype(jnp.int32)))

    assert np.all((np.asarray(a_s) >= 0) & (np.asarray(a_s) < n_passages))
    ref_lp = (jnp.take_along_axis(pri, a_s[:, None], axis=-1)[:, 0]
              - jax.scipy.special.logsumexp(pri, axis=-1))
    np.testing.assert_allclose(np.asarray(lp_s), np.asarray(ref_lp),
                               rtol=1e-5, atol=1e-5)

    print("KERNEL_OK")
</pallas_src>

<mosaic_0001>
module attributes {stable_mosaic.version = 11 : i64} {
  func.func @_act_kernel(%arg0: memref<2x128x6xf32, #tpu.memory_space<vmem>>, %arg1: memref<2x128xi32, #tpu.memory_space<vmem>>, %arg2: memref<2x128xf32, #tpu.memory_space<vmem>>, %arg3: memref<1x128xf32, #tpu.memory_space<vmem>>, %arg4: memref<2x1xi32, #tpu.memory_space<vmem>>, %arg5: memref<2x1xf32, #tpu.memory_space<vmem>>) attributes {dimension_semantics = [], scalar_prefetch = 0 : i64, scratch_operands = 0 : i64, tpu.core_type = #tpu.core_type<tc>} {
    %c0 = arith.constant 0 : index
    %c0_0 = arith.constant 0 : index
    %c0_1 = arith.constant 0 : index
    %0 = vector.load %arg0[%c0, %c0_0, %c0_1] : memref<2x128x6xf32, #tpu.memory_space<vmem>>, vector<2x128x6xf32>
    %c0_2 = arith.constant 0 : index
    %c0_3 = arith.constant 0 : index
    %1 = vector.load %arg1[%c0_2, %c0_3] : memref<2x128xi32, #tpu.memory_space<vmem>>, vector<2x128xi32>
    %c0_4 = arith.constant 0 : index
    %c0_5 = arith.constant 0 : index
    %2 = vector.load %arg2[%c0_4, %c0_5] : memref<2x128xf32, #tpu.memory_space<vmem>>, vector<2x128xf32>
    %c0_6 = arith.constant 0 : index
    %c0_7 = arith.constant 0 : index
    %3 = vector.load %arg3[%c0_6, %c0_7] : memref<1x128xf32, #tpu.memory_space<vmem>>, vector<1x128xf32>
    %4 = tpu.iota {dimensions = array<i32: 2>} : vector<2x128x6xi32>
    %5 = vector.shape_cast %1 : vector<2x128xi32> to vector<2x128x1xi32>
    %6 = vector.broadcast %5 : vector<2x128x1xi32> to vector<2x128x6xi32>
    %7 = arith.cmpi eq, %4, %6 : vector<2x128x6xi32>
    %cst = arith.constant 0.000000e+00 : f32
    %8 = vector.broadcast %cst : f32 to vector<2x128x6xf32>
    %9 = arith.select %7, %0, %8 : vector<2x128x6xi1>, vector<2x128x6xf32>
    %cst_8 = arith.constant dense<0.000000e+00> : vector<2x128xf32>
    %10 = vector.multi_reduction <add>, %9, %cst_8 [2] : vector<2x128x6xf32> to vector<2x128xf32>
    %c0_i32 = arith.constant 0 : i32
    %11 = vector.broadcast %c0_i32 : i32 to vector<2x128xi32>
    %12 = arith.cmpi slt, %1, %11 : vector<2x128xi32>
    %13 = vector.shape_cast %3 : vector<1x128xf32> to vector<1x128xf32>
    %14 = vector.broadcast %13 : vector<1x128xf32> to vector<2x128xf32>
    %15 = arith.select %12, %14, %10 : vector<2x128xi1>, vector<2x128xf32>
    %cst_9 = arith.constant 1.000000e+00 : f32
    %16 = vector.broadcast %cst_9 : f32 to vector<2x128xf32>
    %17 = arith.subf %16, %2 : vector<2x128xf32>
    %cst_10 = arith.constant -1.000000e+05 : f32
    %18 = vector.broadcast %cst_10 : f32 to vector<2x128xf32>
    %19 = arith.mulf %17, %18 : vector<2x128xf32>
    %20 = arith.addf %15, %19 : vector<2x128xf32>
    %21 = tpu.iota {dimensions = array<i32: 1>} : vector<2x128xi32>
    %c8_i32 = arith.constant 8 : i32
    %22 = vector.broadcast %c8_i32 : i32 to vector<2x128xi32>
    %23 = arith.cmpi slt, %21, %22 : vector<2x128xi32>
    %cst_11 = arith.constant -1.000000e+30 : f32
    %24 = vector.broadcast %cst_11 : f32 to vector<2x128xf32>
    %25 = arith.select %23, %20, %24 : vector<2x128xi1>, vector<2x128xf32>
    %cst_12 = arith.constant dense<0xFF800000> : vector<2xf32>
    %26 = vector.multi_reduction <maximumf>, %25, %cst_12 [1] : vector<2x128xf32> to vector<2xf32>
    %27 = vector.shape_cast %26 : vector<2xf32> to vector<2x1xf32>
    %28 = vector.broadcast %27 : vector<2x1xf32> to vector<2x128xf32>
    %29 = arith.cmpf oeq, %25, %28 : vector<2x128xf32>
    %c128_i32 = arith.constant 128 : i32
    %30 = vector.broadcast %c128_i32 : i32 to vector<2x128xi32>
    %31 = arith.select %29, %21, %30 : vector<2x128xi1>, vector<2x128xi32>
    %cst_13 = arith.constant dense<2147483647> : vector<2xi32>
    %32 = vector.multi_reduction <minsi>, %31, %cst_13 [1] : vector<2x128xi32> to vector<2xi32>
    %33 = vector.shape_cast %32 : vector<2xi32> to vector<2x1xi32>
    %cst_14 = arith.constant -1.000000e+00 : f32
    %34 = vector.broadcast %cst_14 : f32 to vector<2x1xf32>
    %c0_15 = arith.constant 0 : index
    %c0_16 = arith.constant 0 : index
    %35 = vector.load %arg4[%c0_15, %c0_16] : memref<2x1xi32, #tpu.memory_space<vmem>>, vector<2x1xi32>
    tpu.vector_store %arg4[%c0_15, %c0_16], %33 {strides = array<i32>} : memref<2x1xi32, #tpu.memory_space<vmem>>, vector<2x1xi32>,
    %c0_17 = arith.constant 0 : index
    %c0_18 = arith.constant 0 : index
    %36 = vector.load %arg5[%c0_17, %c0_18] : memref<2x1xf32, #tpu.memory_space<vmem>>, vector<2x1xf32>
    tpu.vector_store %arg5[%c0_17, %c0_18], %34 {strides = array<i32>} : memref<2x1xf32, #tpu.memory_space<vmem>>, vector<2x1xf32>,
    return
  }
}

</mosaic_0001>

<bundles_post_ra>
// kernel: tpu_custom_call.1
= control target key start
LH: loop header
LB: loop body
LE: loop exit
PB: predicated region body
PF: predicated region fallthrough
CT: control target
= control target key end

     0   :  { %v54_v0 = vlaneseq  ;;  %vm254_vm0 = vcmask 48128   ;;  %s1010_s1 = inlined_call_operand.vmem [shape: s32[2,128], index: 1, kind: input, shape index: {}]   ;;  %s1011_s0 = inlined_call_operand.vmem [shape: f32[2,128,6], index: 0, kind: input, shape index: {}]   ;;  %s1012_s2 = inlined_call_operand.vmem [shape: f32[2,128], index: 2, kind: input, shape index: {}]   ;;  %s1013_s3 = inlined_call_operand.vmem [shape: f32[1,128], index: 3, kind: input, shape index: {}]   ;;  %s1014_s5 = inlined_call_operand.vmem [shape: f32[2,1], index: 5, kind: output, shape index: {1}]   ;;  %s1015_s4 = inlined_call_operand.vmem [shape: s32[2,1], index: 4, kind: output, shape index: {0}]  }
   0x1   :  { %v657_v2 = vld [vmem:[%s1010_s1] sm:$0x3]  ;;  %v20_v15 = vld [vmem:[%s1011_s0 + $0x8] sm:$0xff]  ;;  %v21_v23 = vld [vmem:[%s1011_s0 + $0x10] sm:$0xff] }
   0x2   :  { %v652_v1 = vshrl.u32 %v54_v0, 7  ;;  %v663_v7 = vand.u32 127, %v54_v0  ;;  %v19_v8 = vld [vmem:[%s1011_s0] sm:$0xff]  ;;  %v36_v16 = vld [vmem:[%s1011_s0 + $0x88] sm:$0xff]  ;;  %v37_v24 = vld [vmem:[%s1011_s0 + $0x90] sm:$0xff] }
   0x3   :  { %v35_v9 = vld [vmem:[%s1011_s0 + $0x80] sm:$0xff]  ;;  %v22_v31 = vld [vmem:[%s1011_s0 + $0x18] sm:$0xff]  ;;  %v24_v47 = vld [vmem:[%s1011_s0 + $0x28] sm:$0xff] }
   0x4   :  { %v58_v3 = vsub.s32 0, %v652_v1  ;;  %v125_v4 = vsub.s32 1, %v652_v1  ;;  %v38_v32 = vld [vmem:[%s1011_s0 + $0x98] sm:$0xff]  ;;  %v23_v39 = vld [vmem:[%s1011_s0 + $0x20] sm:$0xff]  ;;  %v40_v48 = vld [vmem:[%s1011_s0 + $0xa8] sm:$0xff] }
   0x5   :  { %v39_v40 = vld [vmem:[%s1011_s0 + $0xa0] sm:$0xff]  ;;  %v25_v55 = vld [vmem:[%s1011_s0 + $0x30] sm:$0xff]  ;;  %v26_v63 = vld [vmem:[%s1011_s0 + $0x38] sm:$0xff] }
   0x6   :  { %v59_v5 = vrot.slane %v657_v2, %v58_v3  ;;  %v126_v6 = vrot.slane %v657_v2, %v125_v4  ;;  %v41_v56 = vld [vmem:[%s1011_s0 + $0xb0] sm:$0xff]  ;;  %v42_v0 = vld [vmem:[%s1011_s0 + $0xb8] sm:$0xff] }
   0x8   :  { %61 = vbcast.lane.b32.xlu0 %v59_v5, 256  ;;  %128 = vbcast.lane.b32.xlu1 %v126_v6, 256 }
   0xc   :  { %65 = vbcast.lane.b32.xlu0 %v59_v5, 264  ;;  %132 = vbcast.lane.b32.xlu1 %v126_v6, 264 }
  0x10   :  { %69 = vbcast.lane.b32.xlu0 %v59_v5, 272  ;;  %136 = vbcast.lane.b32.xlu1 %v126_v6, 272 }
  0x14   :  { %73 = vbcast.lane.b32.xlu0 %v59_v5, 280  ;;  %140 = vbcast.lane.b32.xlu1 %v126_v6, 280 }
  0x18   :  { %77 = vbcast.lane.b32.xlu0 %v59_v5, 288  ;;  %144 = vbcast.lane.b32.xlu1 %v126_v6, 288 }
  0x1c   :  { %81 = vbcast.lane.b32.xlu0 %v59_v5, 296  ;;  %148 = vbcast.lane.b32.xlu1 %v126_v6, 296 }
  0x20   :  { %85 = vbcast.lane.b32.xlu0 %v59_v5, 304  ;;  %152 = vbcast.lane.b32.xlu1 %v126_v6, 304 }
  0x24   :  { %89 = vbcast.lane.b32.xlu0 %v59_v5, 312  ;;  %156 = vbcast.lane.b32.xlu1 %v126_v6, 312 }
  0x28   :  { %93 = vbcast.lane.b32.xlu0 %v59_v5, 320  ;;  %160 = vbcast.lane.b32.xlu1 %v126_v6, 320 }
  0x2c   :  { %97 = vbcast.lane.b32.xlu0 %v59_v5, 328  ;;  %164 = vbcast.lane.b32.xlu1 %v126_v6, 328 }
  0x30   :  { %101 = vbcast.lane.b32.xlu0 %v59_v5, 336  ;;  %168 = vbcast.lane.b32.xlu1 %v126_v6, 336 }
  0x34   :  { %105 = vbcast.lane.b32.xlu0 %v59_v5, 344  ;;  %172 = vbcast.lane.b32.xlu1 %v126_v6, 344 }
  0x38   :  { %109 = vbcast.lane.b32.xlu0 %v59_v5, 352  ;;  %176 = vbcast.lane.b32.xlu1 %v126_v6, 352 }
  0x3c   :  { %113 = vbcast.lane.b32.xlu0 %v59_v5, 360  ;;  %180 = vbcast.lane.b32.xlu1 %v126_v6, 360 }
  0x40   :  { %117 = vbcast.lane.b32.xlu0 %v59_v5, 368  ;;  %184 = vbcast.lane.b32.xlu1 %v126_v6, 368 }
  0x44   :  { %121 = vbcast.lane.b32.xlu0 %v59_v5, 376  ;;  %188 = vbcast.lane.b32.xlu1 %v126_v6, 376 }
  0x7a   :  { %v62_v10 = vpop.permute.xlu0 %61  ;;  %v129_v11 = vpop.permute.xlu1 %128 }
  0x7b   :  { %vm190_vm1 = vcmp.eq.s32.totalorder %v663_v7, %v62_v10  ;;  %vm206_vm2 = vcmp.eq.s32.totalorder %v663_v7, %v129_v11  ;;  %v27_v10 = vld [vmem:[%s1011_s0 + $0x40] sm:$0xff] }
  0x7c   :  { %v222_v12 = vsel %vm190_vm1, %v19_v8, 0.0  ;;  %v238_v13 = vsel %vm206_vm2, %v35_v9, 0.0  ;;  %v43_v11 = vld [vmem:[%s1011_s0 + $0xc0] sm:$0xff] }
  0x7d   :  { %v255_v14 = vsel %vm254_vm0, %v222_v12, 0.0  ;;  %v303_v19 = vsel %vm254_vm0, %v238_v13, 0.0 }
  0x7e   :  { %v66_v17 = vpop.permute.xlu0 %65  ;;  %256 = vadd.xlane.f32.xlu0 %v255_v14  ;;  %v133_v18 = vpop.permute.xlu1 %132 }
  0x7f   :  { %vm191_vm3 = vcmp.eq.s32.totalorder %v663_v7, %v66_v17  ;;  %vm207_vm4 = vcmp.eq.s32.totalorder %v663_v7, %v133_v18  ;;  %v28_v18 = vld [vmem:[%s1011_s0 + $0x48] sm:$0xff] }
  0x80   :  { %v223_v20 = vsel %vm191_vm3, %v20_v15, 0.0  ;;  %v239_v21 = vsel %vm207_vm4, %v36_v16, 0.0 }
  0x81   :  { %v258_v22 = vsel %vm254_vm0, %v223_v20, 0.0  ;;  %v306_v27 = vsel %vm254_vm0, %v239_v21, 0.0 }
  0x82   :  { %v70_v25 = vpop.permute.xlu0 %69  ;;  %259 = vadd.xlane.f32.xlu1 %v258_v22  ;;  %304 = vadd.xlane.f32.xlu0 %v303_v19  ;;  %v137_v26 = vpop.permute.xlu1 %136  ;;  %v44_v19 = vld [vmem:[%s1011_s0 + $0xc8] sm:$0xff] }
  0x83   :  { %vm192_vm5 = vcmp.eq.s32.totalorder %v663_v7, %v70_v25  ;;  %vm208_vm6 = vcmp.eq.s32.totalorder %v663_v7, %v137_v26  ;;  %v29_v26 = vld [vmem:[%s1011_s0 + $0x50] sm:$0xff] }
  0x84   :  { %v224_v28 = vsel %vm192_vm5, %v21_v23, 0.0  ;;  %v240_v29 = vsel %vm208_vm6, %v37_v24, 0.0 }
  0x85   :  { %v261_v30 = vsel %vm254_vm0, %v224_v28, 0.0  ;;  %v309_v35 = vsel %vm254_vm0, %v240_v29, 0.0 }
  0x86   :  { %v74_v33 = vpop.permute.xlu0 %73  ;;  %262 = vadd.xlane.f32.xlu1 %v261_v30  ;;  %307 = vadd.xlane.f32.xlu0 %v306_v27  ;;  %v141_v34 = vpop.permute.xlu1 %140  ;;  %v45_v27 = vld [vmem:[%s1011_s0 + $0xd0] sm:$0xff] }
  0x87   :  { %vm193_vm7 = vcmp.eq.s32.totalorder %v663_v7, %v74_v33  ;;  %vm209_vm8 = vcmp.eq.s32.totalorder %v663_v7, %v141_v34  ;;  %v30_v34 = vld [vmem:[%s1011_s0 + $0x58] sm:$0xff] }
  0x88   :  { %v225_v36 = vsel %vm193_vm7, %v22_v31, 0.0  ;;  %v241_v37 = vsel %vm209_vm8, %v38_v32, 0.0 }
  0x89   :  { %v264_v38 = vsel %vm254_vm0, %v225_v36, 0.0  ;;  %v312_v43 = vsel %vm254_vm0, %v241_v37, 0.0 }
  0x8a   :  { %v78_v41 = vpop.permute.xlu0 %77  ;;  %265 = vadd.xlane.f32.xlu1 %v264_v38  ;;  %310 = vadd.xlane.f32.xlu0 %v309_v35  ;;  %v145_v42 = vpop.permute.xlu1 %144  ;;  %v46_v35 = vld [vmem:[%s1011_s0 + $0xd8] sm:$0xff] }
  0x8b   :  { %vm194_vm9 = vcmp.eq.s32.totalorder %v663_v7, %v78_v41  ;;  %vm210_vm10 = vcmp.eq.s32.totalorder %v663_v7, %v145_v42  ;;  %v31_v42 = vld [vmem:[%s1011_s0 + $0x60] sm:$0xff] }
  0x8c   :  { %v226_v44 = vsel %vm194_vm9, %v23_v39, 0.0  ;;  %v242_v45 = vsel %vm210_vm10, %v39_v40, 0.0 }
  0x8d   :  { %v267_v46 = vsel %vm254_vm0, %v226_v44, 0.0  ;;  %v315_v51 = vsel %vm254_vm0, %v242_v45, 0.0 }
  0x8e   :  { %v82_v49 = vpop.permute.xlu0 %81  ;;  %268 = vadd.xlane.f32.xlu1 %v267_v46  ;;  %313 = vadd.xlane.f32.xlu0 %v312_v43  ;;  %v149_v50 = vpop.permute.xlu1 %148  ;;  %v47_v43 = vld [vmem:[%s1011_s0 + $0xe0] sm:$0xff] }
  0x8f   :  { %vm195_vm11 = vcmp.eq.s32.totalorder %v663_v7, %v82_v49  ;;  %vm211_vm12 = vcmp.eq.s32.totalorder %v663_v7, %v149_v50  ;;  %v32_v50 = vld [vmem:[%s1011_s0 + $0x68] sm:$0xff] }
  0x90   :  { %v227_v52 = vsel %vm195_vm11, %v24_v47, 0.0  ;;  %v243_v53 = vsel %vm211_vm12, %v40_v48, 0.0 }
  0x91   :  { %v270_v54 = vsel %vm254_vm0, %v227_v52, 0.0  ;;  %v318_v59 = vsel %vm254_vm0, %v243_v53, 0.0 }
  0x92   :  { %v86_v57 = vpop.permute.xlu0 %85  ;;  %271 = vadd.xlane.f32.xlu1 %v270_v54  ;;  %316 = vadd.xlane.f32.xlu0 %v315_v51  ;;  %v153_v58 = vpop.permute.xlu1 %152  ;;  %v48_v51 = vld [vmem:[%s1011_s0 + $0xe8] sm:$0xff] }
  0x93   :  { %vm196_vm13 = vcmp.eq.s32.totalorder %v663_v7, %v86_v57  ;;  %vm212_vm14 = vcmp.eq.s32.totalorder %v663_v7, %v153_v58  ;;  %v33_v58 = vld [vmem:[%s1011_s0 + $0x70] sm:$0xff] }
  0x94   :  { %v228_v60 = vsel %vm196_vm13, %v25_v55, 0.0  ;;  %v244_v61 = vsel %vm212_vm14, %v41_v56, 0.0 }
  0x95   :  { %v273_v62 = vsel %vm254_vm0, %v228_v60, 0.0  ;;  %v321_v5 = vsel %vm254_vm0, %v244_v61, 0.0 }
  0x96   :  { %v90_v3 = vpop.permute.xlu0 %89  ;;  %274 = vadd.xlane.f32.xlu1 %v273_v62  ;;  %319 = vadd.xlane.f32.xlu0 %v318_v59  ;;  %v157_v4 = vpop.permute.xlu1 %156  ;;  %v49_v59 = vld [vmem:[%s1011_s0 + $0xf0] sm:$0xff] }
  0x97   :  { %vm197_vm15 = vcmp.eq.s32.totalorder %v663_v7, %v90_v3  ;;  %vm213_vm1 = vcmp.eq.s32.totalorder %v663_v7, %v157_v4  ;;  %v34_v4 = vld [vmem:[%s1011_s0 + $0x78] sm:$0xff] }
  0x98   :  { %v229_v6 = vsel %vm197_vm15, %v26_v63, 0.0  ;;  %v245_v8 = vsel %vm213_vm1, %v42_v0, 0.0 }
  0x99   :  { %v276_v9 = vsel %vm254_vm0, %v229_v6, 0.0  ;;  %v324_v14 = vsel %vm254_vm0, %v245_v8, 0.0 }
  0x9a   :  { %v94_v12 = vpop.permute.xlu0 %93  ;;  %277 = vadd.xlane.f32.xlu1 %v276_v9  ;;  %322 = vadd.xlane.f32.xlu0 %v321_v5  ;;  %v161_v13 = vpop.permute.xlu1 %160  ;;  %v50_v5 = vld [vmem:[%s1011_s0 + $0xf8] sm:$0xff] }
  0x9b   :  { %vm198_vm2 = vcmp.eq.s32.totalorder %v663_v7, %v94_v12  ;;  %vm214_vm3 = vcmp.eq.s32.totalorder %v663_v7, %v161_v13 }
  0x9c   :  { %v230_v15 = vsel %vm198_vm2, %v27_v10, 0.0  ;;  %v246_v16 = vsel %vm214_vm3, %v43_v11, 0.0  ;;  %vm406_vm3 = vcmask 195712  }
  0x9d   :  { %v279_v17 = vsel %vm254_vm0, %v230_v15, 0.0  ;;  %v327_v22 = vsel %vm254_vm0, %v246_v16, 0.0 }
  0x9e   :  { %v98_v20 = vpop.permute.xlu0 %97  ;;  %280 = vadd.xlane.f32.xlu1 %v279_v17  ;;  %325 = vadd.xlane.f32.xlu0 %v324_v14  ;;  %v165_v21 = vpop.permute.xlu1 %164 }
  0x9f   :  { %vm199_vm4 = vcmp.eq.s32.totalorder %v663_v7, %v98_v20  ;;  %vm215_vm5 = vcmp.eq.s32.totalorder %v663_v7, %v165_v21 }
  0xa0   :  { %v231_v23 = vsel %vm199_vm4, %v28_v18, 0.0  ;;  %v247_v24 = vsel %vm215_vm5, %v44_v19, 0.0  ;;  %vm413_vm4 = vcmask 261312   ;;  %vm420_vm5 = vcmask 326912  }
  0xa1   :  { %v282_v25 = vsel %vm254_vm0, %v231_v23, 0.0  ;;  %v330_v30 = vsel %vm254_vm0, %v247_v24, 0.0 }
  0xa2   :  { %v102_v28 = vpop.permute.xlu0 %101  ;;  %283 = vadd.xlane.f32.xlu1 %v282_v25  ;;  %328 = vadd.xlane.f32.xlu0 %v327_v22  ;;  %v169_v29 = vpop.permute.xlu1 %168 }
  0xa3   :  { %vm200_vm6 = vcmp.eq.s32.totalorder %v663_v7, %v102_v28  ;;  %vm216_vm7 = vcmp.eq.s32.totalorder %v663_v7, %v169_v29 }
  0xa4   :  { %v232_v31 = vsel %vm200_vm6, %v29_v26, 0.0  ;;  %v248_v32 = vsel %vm216_vm7, %v45_v27, 0.0  ;;  %vm427_vm6 = vcmask 392512   ;;  %vm434_vm7 = vcmask 458112  }
  0xa5   :  { %v285_v33 = vsel %vm254_vm0, %v232_v31, 0.0  ;;  %v333_v38 = vsel %vm254_vm0, %v248_v32, 0.0 }
  0xa6   :  { %v106_v36 = vpop.permute.xlu0 %105  ;;  %286 = vadd.xlane.f32.xlu1 %v285_v33  ;;  %331 = vadd.xlane.f32.xlu0 %v330_v30  ;;  %v173_v37 = vpop.permute.xlu1 %172  ;;  %v394_v33 = vadd.s32 4294967288, %v663_v7 }
  0xa7   :  { %vm201_vm8 = vcmp.eq.s32.totalorder %v663_v7, %v106_v36  ;;  %vm217_vm9 = vcmp.eq.s32.totalorder %v663_v7, %v173_v37 }
  0xa8   :  { %v233_v39 = vsel %vm201_vm8, %v30_v34, 0.0  ;;  %v249_v40 = vsel %vm217_vm9, %v46_v35, 0.0  ;;  %v401_v34 = vadd.s32 4294967280, %v663_v7  ;;  %v408_v35 = vadd.s32 4294967272, %v663_v7 }
  0xa9   :  { %v288_v41 = vsel %vm254_vm0, %v233_v39, 0.0  ;;  %v336_v46 = vsel %vm254_vm0, %v249_v40, 0.0  ;;  %v392_v39 = vsub.s32 %v663_v7, %v652_v1  ;;  %v397_v40 = vsub.s32 %v394_v33, %v652_v1 }
  0xaa   :  { %v110_v44 = vpop.permute.xlu0 %109  ;;  %289 = vadd.xlane.f32.xlu1 %v288_v41  ;;  %334 = vadd.xlane.f32.xlu0 %v333_v38  ;;  %v177_v45 = vpop.permute.xlu1 %176  ;;  %v415_v38 = vadd.s32 4294967264, %v663_v7  ;;  %v422_v41 = vadd.s32 4294967256, %v663_v7  ;;  %vm441_vm8 = vcmask 523712   ;;  %vm448_vm9 = vcmask 589312  }
  0xab   :  { %vm202_vm10 = vcmp.eq.s32.totalorder %v663_v7, %v110_v44  ;;  %vm218_vm11 = vcmp.eq.s32.totalorder %v663_v7, %v177_v45  ;;  %v436_v44 = vadd.s32 4294967240, %v663_v7  ;;  %v411_v45 = vsub.s32 %v408_v35, %v652_v1 }
  0xac   :  { %v234_v47 = vsel %vm202_vm10, %v31_v42, 0.0  ;;  %v250_v48 = vsel %vm218_vm11, %v47_v43, 0.0  ;;  %v404_v42 = vsub.s32 %v401_v34, %v652_v1  ;;  %v429_v43 = vadd.s32 4294967248, %v663_v7 }
  0xad   :  { %v291_v49 = vsel %vm254_vm0, %v234_v47, 0.0  ;;  %v339_v54 = vsel %vm254_vm0, %v250_v48, 0.0  ;;  %v450_v47 = vadd.s32 4294967224, %v663_v7  ;;  %v457_v48 = vadd.s32 4294967216, %v663_v7 }
  0xae   :  { %v114_v52 = vpop.permute.xlu0 %113  ;;  %292 = vadd.xlane.f32.xlu1 %v291_v49  ;;  %337 = vadd.xlane.f32.xlu0 %v336_v46  ;;  %v181_v53 = vpop.permute.xlu1 %180  ;;  %v443_v46 = vadd.s32 4294967232, %v663_v7  ;;  %vm455_vm10 = vcmask 654912   ;;  %vm462_vm11 = vcmask 720512  }
  0xaf   :  { %vm203_vm12 = vcmp.eq.s32.totalorder %v663_v7, %v114_v52  ;;  %vm219_vm13 = vcmp.eq.s32.totalorder %v663_v7, %v181_v53  ;;  %v464_v52 = vadd.s32 4294967208, %v663_v7  ;;  %v471_v53 = vadd.s32 4294967200, %v663_v7 }
  0xb0   :  { %v235_v55 = vsel %vm203_vm12, %v32_v50, 0.0  ;;  %v251_v56 = vsel %vm219_vm13, %v48_v51, 0.0  ;;  %v418_v51 = vsub.s32 %v415_v38, %v652_v1  ;;  %vm469_vm12 = vcmask 786112  }
  0xb1   :  { %v294_v57 = vsel %vm254_vm0, %v235_v55, 0.0  ;;  %v342_v62 = vsel %vm254_vm0, %v251_v56, 0.0  ;;  %v478_v55 = vadd.s32 4294967192, %v663_v7  ;;  %v485_v56 = vadd.s32 4294967184, %v663_v7 }
  0xb2   :  { %v118_v60 = vpop.permute.xlu0 %117  ;;  %295 = vadd.xlane.f32.xlu1 %v294_v57  ;;  %340 = vadd.xlane.f32.xlu0 %v339_v54  ;;  %v185_v61 = vpop.permute.xlu1 %184  ;;  %v425_v54 = vsub.s32 %v422_v41, %v652_v1  ;;  %v432_v57 = vsub.s32 %v429_v43, %v652_v1  ;;  %vm476_vm13 = vcmask 851712  }
  0xb3   :  { %vm204_vm14 = vcmp.eq.s32.totalorder %v663_v7, %v118_v60  ;;  %vm220_vm15 = vcmp.eq.s32.totalorder %v663_v7, %v185_v61  ;;  %v898_v60 = vsub.s32 %v450_v47, %v652_v1  ;;  %v901_v61 = vsub.s32 %v457_v48, %v652_v1 }
  0xb4   :  { %v236_v63 = vsel %vm204_vm14, %v33_v58, 0.0  ;;  %v252_v0 = vsel %vm220_vm15, %v49_v59, 0.0  ;;  %v439_v58 = vsub.s32 %v436_v44, %v652_v1  ;;  %v895_v59 = vsub.s32 %v443_v46, %v652_v1 }
  0xb5   :  { %v297_v3 = vsel %vm254_vm0, %v236_v63, 0.0  ;;  %v345_v9 = vsel %vm254_vm0, %v252_v0, 0.0  ;;  %v492_v0 = vadd.s32 4294967176, %v663_v7  ;;  %vm483_vm14 = vcmask 917312  }
  0xb6   :  { %v122_v6 = vpop.permute.xlu0 %121  ;;  %298 = vadd.xlane.f32.xlu1 %v297_v3  ;;  %343 = vadd.xlane.f32.xlu0 %v342_v62  ;;  %v189_v8 = vpop.permute.xlu1 %188  ;;  %vm490_vm15 = vcmask 982912  }
  0xb7   :  { %vm205_vm1 = vcmp.eq.s32.totalorder %v663_v7, %v122_v6  ;;  %vm221_vm2 = vcmp.eq.s32.totalorder %v663_v7, %v189_v8  ;;  %v914_v6 = vsub.s32 %v471_v53, %v652_v1  ;;  %v919_v8 = vld [vmem:[%s1012_s2] sm:$0x3]  ;;  %v936_v38 = vsub.s32 %v492_v0, %v652_v1 }
  0xb8   :  { %v237_v10 = vsel %vm205_vm1, %v34_v4, 0.0  ;;  %v253_v11 = vsel %vm221_vm2, %v50_v5, 0.0  ;;  %v911_v5 = vsub.s32 %v464_v52, %v652_v1  ;;  %vm497_vm1 = vcmask 1048512  }
  0xb9   :  { %v300_v12 = vsel %vm254_vm0, %v237_v10, 0.0  ;;  %v348_v13 = vsel %vm254_vm0, %v253_v11, 0.0  ;;  %vm399_vm0 = vcmask 130112   ;;  %v924_v11 = vsub.s32 %v478_v55, %v652_v1 }
  0xba   :  { %301 = vadd.xlane.f32.xlu1 %v300_v12  ;;  %346 = vadd.xlane.f32.xlu0 %v345_v9  ;;  %v927_v12 = vsub.s32 %v485_v56, %v652_v1  ;;  %vm578_vm2 = vcmask 1041409  }
  0xbe   :  { %349 = vadd.xlane.f32.xlu0 %v348_v13 }
 0x107   :  { %v825_v14 = vpop.xlane.xlu0 %256 }
 0x108   :  { %v393_v13 = vrot.slane %v825_v14, %v392_v39 }
 0x10b   :  { %v827_v15 = vpop.xlane.xlu1 %259  ;;  %v829_v16 = vpop.xlane.xlu0 %304 }
 0x10c   :  { %v398_v3 = vrot.slane %v827_v15, %v397_v40  ;;  %v502_v15 = vrot.slane %v829_v16, %v392_v39 }
 0x10e   :  { %v400_v14 = vsel %vm399_vm0, %v398_v3, %v393_v13 }
 0x10f   :  { %v831_v17 = vpop.xlane.xlu1 %262  ;;  %v833_v18 = vpop.xlane.xlu0 %307 }
 0x110   :  { %v506_v4 = vrot.slane %v833_v18, %v397_v40  ;;  %v405_v9 = vrot.slane %v831_v17, %v404_v42  ;;  %v582_v40 = vsub.f32 1.0, %v919_v8  ;;  %v621_v8 = vmov -1.0  }
 0x112   :  { %v507_v16 = vsel %vm399_vm0, %v506_v4, %v502_v15  ;;  %vm351_vm0 = vcmp.lt.s32.totalorder %v657_v2, 0 }
 0x113   :  { %v835_v19 = vpop.xlane.xlu1 %265  ;;  %v837_v20 = vpop.xlane.xlu0 %310 }
 0x114   :  { %v511_v10 = vrot.slane %v837_v20, %v404_v42  ;;  %v412_v18 = vrot.slane %v835_v19, %v411_v45 }
 0x117   :  { %v839_v21 = vpop.xlane.xlu1 %268  ;;  %v841_v22 = vpop.xlane.xlu0 %313 }
 0x118   :  { %v516_v33 = vrot.slane %v841_v22, %v411_v45  ;;  %v419_v17 = vrot.slane %v839_v21, %v418_v51  ;;  %v407_v21 = vsel %vm406_vm3, %v405_v9, %v400_v14 }
 0x119   :  { %v414_v41 = vsel %vm413_vm4, %v412_v18, %v407_v21 }
 0x11b   :  { %v843_v23 = vpop.xlane.xlu1 %271  ;;  %v845_v24 = vpop.xlane.xlu0 %316 }
 0x11c   :  { %v521_v20 = vrot.slane %v845_v24, %v418_v51  ;;  %v426_v19 = vrot.slane %v843_v23, %v425_v54  ;;  %v512_v24 = vsel %vm406_vm3, %v511_v10, %v507_v16  ;;  %vm585_vm3 = vcmp.lt.s32.totalorder %v663_v7, 8 }
 0x11d   :  { %v517_v42 = vsel %vm413_vm4, %v516_v33, %v512_v24  ;;  %vm587_vm4 = vcmask 1041408  }
 0x11e   :  { %v522_v44 = vsel %vm420_vm5, %v521_v20, %v517_v42  ;;  %v583_v20 = vmul.f32 -100000.0, %v582_v40 }
 0x11f   :  { %v847_v25 = vpop.xlane.xlu1 %274  ;;  %v849_v26 = vpop.xlane.xlu0 %319 }
 0x120   :  { %v526_v22 = vrot.slane %v849_v26, %v425_v54  ;;  %v433_v39 = vrot.slane %v847_v25, %v432_v57  ;;  %v421_v26 = vsel %vm420_vm5, %v419_v17, %v414_v41  ;;  %v619_v17 = vld [vmem:[%s1013_s3] ss:$0 sm:$0xff] }
 0x121   :  { %v428_v47 = vsel %vm427_vm6, %v426_v19, %v421_v26 }
 0x122   :  { %v527_v48 = vsel %vm427_vm6, %v526_v22, %v522_v44  ;;  %v435_v51 = vsel %vm434_vm7, %v433_v39, %v428_v47  ;;  %vm608_vm6 = vcmask 1024  }
 0x123   :  { %v851_v27 = vpop.xlane.xlu1 %277  ;;  %v853_v28 = vpop.xlane.xlu0 %322  ;;  %610 = vst.msk [vmem:[%s1014_s5] sm:$0x3] %vm608_vm6, %v621_v8 }
 0x124   :  { %v531_v1 = vrot.slane %v853_v28, %v432_v57  ;;  %v440_v43 = vrot.slane %v851_v27, %v439_v58 }
 0x126   :  { %v532_v52 = vsel %vm434_vm7, %v531_v1, %v527_v48  ;;  %v442_v53 = vsel %vm441_vm8, %v440_v43, %v435_v51 }
 0x127   :  { %v855_v29 = vpop.xlane.xlu1 %280  ;;  %v857_v30 = vpop.xlane.xlu0 %325 }
 0x128   :  { %v536_v23 = vrot.slane %v857_v30, %v439_v58  ;;  %v447_v45 = vrot.slane %v855_v29, %v895_v59 }
 0x12a   :  { %v537_v54 = vsel %vm441_vm8, %v536_v23, %v532_v52  ;;  %v449_v55 = vsel %vm448_vm9, %v447_v45, %v442_v53 }
 0x12b   :  { %v859_v31 = vpop.xlane.xlu1 %283  ;;  %v861_v32 = vpop.xlane.xlu0 %328 }
 0x12c   :  { %v541_v25 = vrot.slane %v861_v32, %v895_v59  ;;  %v454_v27 = vrot.slane %v859_v31, %v898_v60 }
 0x12e   :  { %v542_v56 = vsel %vm448_vm9, %v541_v25, %v537_v54  ;;  %v456_v59 = vsel %vm455_vm10, %v454_v27, %v449_v55 }
 0x12f   :  { %v866_v36 = vpop.xlane.xlu1 %286  ;;  %v868_v37 = vpop.xlane.xlu0 %331 }
 0x130   :  { %v546_v30 = vrot.slane %v868_v37, %v898_v60  ;;  %v461_v29 = vrot.slane %v866_v36, %v901_v61 }
 0x132   :  { %v547_v60 = vsel %vm455_vm10, %v546_v30, %v542_v56 }
 0x133   :  { %v882_v49 = vpop.xlane.xlu1 %289  ;;  %v884_v50 = vpop.xlane.xlu0 %334 }
 0x134   :  { %v551_v32 = vrot.slane %v884_v50, %v901_v61  ;;  %v468_v31 = vrot.slane %v882_v49, %v911_v5 }
 0x136   :  { %v552_v0 = vsel %vm462_vm11, %v551_v32, %v547_v60 }
 0x137   :  { %v903_v62 = vpop.xlane.xlu1 %292  ;;  %v905_v63 = vpop.xlane.xlu0 %337 }
 0x138   :  { %v556_v37 = vrot.slane %v905_v63, %v911_v5  ;;  %v475_v36 = vrot.slane %v903_v62, %v914_v6  ;;  %v463_v63 = vsel %vm462_vm11, %v461_v29, %v456_v59 }
 0x139   :  { %v470_v4 = vsel %vm469_vm12, %v468_v31, %v463_v63 }
 0x13a   :  { %v557_v5 = vsel %vm469_vm12, %v556_v37, %v552_v0  ;;  %v477_v9 = vsel %vm476_vm13, %v475_v36, %v470_v4 }
 0x13b   :  { %v296_v34 = vpop.xlane.xlu1 %295  ;;  %v341_v35 = vpop.xlane.xlu0 %340 }
 0x13c   :  { %v561_v57 = vrot.slane %v341_v35, %v914_v6  ;;  %v482_v49 = vrot.slane %v296_v34, %v924_v11 }
 0x13e   :  { %v562_v10 = vsel %vm476_vm13, %v561_v57, %v557_v5  ;;  %v484_v13 = vsel %vm483_vm14, %v482_v49, %v477_v9 }
 0x13f   :  { %v299_v28 = vpop.xlane.xlu1 %298  ;;  %v344_v46 = vpop.xlane.xlu0 %343 }
 0x140   :  { %v566_v61 = vrot.slane %v344_v46, %v924_v11  ;;  %v489_v3 = vrot.slane %v299_v28, %v927_v12 }
 0x142   :  { %v567_v15 = vsel %vm483_vm14, %v566_v61, %v562_v10 }
 0x143   :  { %v302_v50 = vpop.xlane.xlu1 %301  ;;  %v347_v58 = vpop.xlane.xlu0 %346 }
 0x144   :  { %v571_v62 = vrot.slane %v347_v58, %v927_v12  ;;  %v496_v6 = vrot.slane %v302_v50, %v936_v38  ;;  %v491_v12 = vsel %vm490_vm15, %v489_v3, %v484_v13 }
 0x146   :  { %v572_v33 = vsel %vm490_vm15, %v571_v62, %v567_v15  ;;  %v498_v34 = vsel %vm497_vm1, %v496_v6, %v491_v12 }
 0x147   :  { %v350_v11 = vpop.xlane.xlu0 %349 }
 0x148   :  { %v576_v18 = vrot.slane %v350_v11, %v936_v38 }
 0x14a   :  { %v577_v35 = vsel %vm497_vm1, %v576_v18, %v572_v33 }
 0x14b   :  { %v579_v14 = vsel %vm578_vm2, %v577_v35, %v498_v34 }
 0x14c   :  { %v581_v16 = vsel %vm351_vm0, %v619_v17, %v579_v14 }
 0x14d   :  { %v584_v19 = vadd.f32 %v583_v20, %v581_v16 }
 0x14f   :  { %v586_v38 = vsel %vm585_vm3, %v584_v19, -1e+30 }
 0x150   :  { %v588_v22 = vsel %vm587_vm4, %v586_v38, -inf }
 0x151   :  { %589 = vmax.xlane.f32.xlu1 %v588_v22 }
 0x1da   :  { %v590_v21 = vpop.xlane.xlu1 %589 }
 0x1db   :  { %vm591_vm5 = vcmp.eq.f32.partialorder %v586_v38, %v590_v21 }
 0x1dc   :  { %v592_v24 = vsel %vm591_vm5, %v663_v7, 128 }
 0x1dd   :  { %v593_v39 = vsel %vm587_vm4, %v592_v24, 2147483647 }
 0x1de   :  { %v595_v2 = vshra.s32 %v593_v39, 16  ;;  %v594_v40 = vand.u32 65535, %v593_v39 }
 0x1e0   :  { %v597_v1 = vcvt.s32.f32 %v595_v2  ;;  %v596_v42 = vcvt.s32.f32 %v594_v40 }
 0x1e2   :  { %598 = vmin.xlane.f32.xlu0 %v597_v1 }
 0x26b   :  { %v599_v41 = vpop.xlane.xlu0 %598 }
 0x26c   :  { %vm600_vm7 = vcmp.eq.f32.partialorder %v597_v1, %v599_v41  ;;  %v605_v23 = vcvt.f32.s32 %v599_v41 }
 0x26d   :  { %v601_v43 = vsel %vm600_vm7, %v596_v42, inf }
 0x26e   :  { %602 = vmin.xlane.f32.xlu1 %v601_v43  ;;  %v606_v44 = vshll.u32 %v605_v23, 16 }
 0x2f7   :  { %v603_v26 = vpop.xlane.xlu1 %602 }
 0x2f8   :  { %v604_v7 = vcvt.f32.s32 %v603_v26 }
 0x2fa   :  { %v607_v45 = vadd.s32 %v606_v44, %v604_v7 }
 0x2fc   :  { %609 = vst.msk [vmem:[%s1015_s4] sm:$0x3] %vm608_vm6, %v607_v45 }

</bundles_post_ra>
